<compile_context>
chip_gen: v5e
topology: v5e:2x2
jax: 0.10.0
libtpu: 0.0.40
codegen_flags: <defaults>
</compile_context>

<pallas_src>
import math

import jax
import jax.numpy as jnp
from jax.experimental import pallas as pl
from jax.experimental.pallas import tpu as pltpu


def _round_up(x, m):
    return ((x + m - 1) // m) * m


# ---------------------------------------------------------------------------
# Pass 1: hidden MLP  h2 = relu(relu(relu(z W0 + b0) W1 + b1) W2 + b2)
# ---------------------------------------------------------------------------
def dgd_hidden_kernel(z_ref, w0_ref, b0_ref, w1_ref, b1_ref, w2_ref, b2_ref,
                      h2_ref):
    x = z_ref[...].astype(jnp.bfloat16)
    h = jnp.dot(x, w0_ref[...], preferred_element_type=jnp.float32)
    h = jnp.maximum(h + b0_ref[...], 0.0).astype(jnp.bfloat16)
    h = jnp.dot(h, w1_ref[...], preferred_element_type=jnp.float32)
    h = jnp.maximum(h + b1_ref[...], 0.0).astype(jnp.bfloat16)
    h = jnp.dot(h, w2_ref[...], preferred_element_type=jnp.float32)
    h = jnp.maximum(h + b2_ref[...], 0.0).astype(jnp.bfloat16)
    h2_ref[...] = h


# ---------------------------------------------------------------------------
# Pass 2: output layer + NBLayer 'max' scaling (sigmoid)
# ---------------------------------------------------------------------------
def dgd_out_kernel(h2_ref, w3_ref, b3_ref, out_ref):
    logits = jnp.dot(h2_ref[...], w3_ref[...],
                     preferred_element_type=jnp.float32) + b3_ref[...]
    # sigmoid(x) = 1 / (1 + exp(-x)); exp + approx reciprocal both run on the
    # EUP slot, so they stay hidden under the output DMA stream.
    out_ref[...] = pl.reciprocal(1.0 + jnp.exp(-logits),
                                 approx=True).astype(out_ref.dtype)


def init_dgd_params(key, latent, hidden, out_dim):
    """Deterministic PyTorch-style (uniform +-1/sqrt(fan_in)) initialization."""
    dims = [latent] + list(hidden) + [out_dim]
    params = []
    for i in range(len(dims) - 1):
        fan_in, fan_out = dims[i], dims[i + 1]
        key, kw, kb = jax.random.split(key, 3)
        bound = 1.0 / math.sqrt(fan_in)
        w = jax.random.uniform(kw, (fan_in, fan_out), jnp.float32, -bound, bound)
        b = jax.random.uniform(kb, (1, fan_out), jnp.float32, -bound, bound)
        params.append((w, b))
    # NBLayer dispersion parameter (log_r) — present in the module but unused
    # in the forward pass (it only enters the NB loss).
    log_r = jnp.full((1, out_dim), math.log(2.0), jnp.float32)
    return params, log_r


def dgd_forward(z, params, *, batch_tile=None, gene_tile=None,
                out_dtype=jnp.bfloat16):
    B, latent = z.shape
    (w0, b0), (w1, b1), (w2, b2), (w3, b3) = params
    h2 = w2.shape[1]
    out_dim = w3.shape[1]

    # Tile selection: batch tile multiple of 8 sublanes, gene tile multiple of
    # 128 lanes.  Non-divisible sizes are handled by zero-padding, never by
    # falling back to a single giant tile.
    tb = batch_tile if batch_tile is not None else min(_round_up(B, 8), 512)
    tb = _round_up(tb, 8)
    tn = gene_tile if gene_tile is not None else min(_round_up(out_dim, 128), 4096)
    tn = _round_up(tn, 128)

    B_pad = _round_up(B, tb)
    out_pad = _round_up(out_dim, tn)

    z_p = z if B_pad == B else jnp.pad(z, ((0, B_pad - B), (0, 0)))
    if out_pad == out_dim:
        w3_p, b3_p = w3, b3
    else:
        w3_p = jnp.pad(w3, ((0, 0), (0, out_pad - out_dim)))
        b3_p = jnp.pad(b3, ((0, 0), (0, out_pad - out_dim)))

    # bf16 matmul operands (MXU-native, halves streamed-w3 DMA bytes); biases
    # stay f32 and are added to the f32 accumulator.
    w0b, w1b, w2b, w3b = (w.astype(jnp.bfloat16) for w in (w0, w1, w2, w3_p))

    # ---- Pass 1: hidden MLP (tiny) -> H2 (B_pad, h2) bf16 -----------------
    def resident(shape):
        return pl.BlockSpec(shape, lambda i: (0,) * len(shape))

    h2_act = pl.pallas_call(
        dgd_hidden_kernel,
        out_shape=jax.ShapeDtypeStruct((B_pad, h2), jnp.bfloat16),
        grid=(B_pad // tb,),
        in_specs=[
            pl.BlockSpec((tb, latent), lambda i: (i, 0)),          # z tile
            resident(w0b.shape), resident(b0.shape),
            resident(w1b.shape), resident(b1.shape),
            resident(w2b.shape), resident(b2.shape),
        ],
        out_specs=pl.BlockSpec((tb, h2), lambda i: (i, 0)),
        compiler_params=pltpu.CompilerParams(
            dimension_semantics=("parallel",)),
    )(z_p, w0b, b0, w1b, b1, w2b, b2)

    # ---- Pass 2: gene-outer / batch-inner grid -----------------------------
    # w3/b3 block indices depend only on the (outer) gene axis, so each column
    # block is DMA'd from HBM exactly once and stays resident while the inner
    # batch loop runs.  Both axes are independent -> "parallel".
    out_bytes = jnp.dtype(out_dtype).itemsize
    main_vmem = 2 * (tb * h2 * 2 + h2 * tn * 2 + tn * 4 + tb * tn * out_bytes)
    # Keep well under v7x's 64 MiB/TC physical VMEM.
    vmem_limit = int(min(max(main_vmem + (8 << 20), 32 << 20), 56 << 20))
    assert main_vmem <= vmem_limit, (
        "tile config too large for VMEM; reduce batch_tile/gene_tile")

    out_padded = pl.pallas_call(
        dgd_out_kernel,
        out_shape=jax.ShapeDtypeStruct((B_pad, out_pad), out_dtype),
        grid=(out_pad // tn, B_pad // tb),          # gene OUTER, batch INNER
        in_specs=[
            pl.BlockSpec((tb, h2), lambda j, i: (i, 0)),   # H2 batch tile
            pl.BlockSpec((h2, tn), lambda j, i: (0, j)),   # w3 column block
            pl.BlockSpec((1, tn), lambda j, i: (0, j)),    # b3 column block
        ],
        out_specs=pl.BlockSpec((tb, tn), lambda j, i: (i, j)),
        compiler_params=pltpu.CompilerParams(
            dimension_semantics=("parallel", "parallel"),
            vmem_limit_bytes=vmem_limit,
        ),
    )(h2_act, w3b, b3_p)

    # Slice away batch / gene padding.
    return out_padded[:B, :out_dim]


def dgd_reference(z, params):
    """Pure-JAX f32 reference of the same forward pass."""
    (w0, b0), (w1, b1), (w2, b2), (w3, b3) = params
    h = jnp.maximum(z @ w0 + b0, 0.0)
    h = jnp.maximum(h @ w1 + b1, 0.0)
    h = jnp.maximum(h @ w2 + b2, 0.0)
    return jax.nn.sigmoid(h @ w3 + b3)


if __name__ == "__main__":
    # Small shapes consistent with the module defaults (latent=20,
    # hidden=[100,100,100]); deliberately non-aligned batch (52) and gene
    # count (300) to exercise the padding path, with small tiles so the main
    # kernel runs a 3 (gene) x 4 (batch) grid.
    B, LATENT, HIDDEN, OUT = 52, 20, [100, 100, 100], 300

    key = jax.random.PRNGKey(0)
    key, kz = jax.random.split(key)
    z = jax.random.normal(kz, (B, LATENT), jnp.float32)

    params, log_r = init_dgd_params(key, LATENT, HIDDEN, OUT)
    # TODO(synk): scaling_type='sum' (softmax over genes) and the NB-loss use
    # of log_r are not part of forward() and are not implemented here.

    out = dgd_forward(z, params, batch_tile=16, gene_tile=128)
    out = jax.block_until_ready(out)

    ref = dgd_reference(z, params)
    assert out.shape == (B, OUT)
    # bf16 matmul operands + bf16 output + approx reciprocal vs f32 reference:
    # sigmoid outputs agree to ~1e-2.
    err = float(jnp.max(jnp.abs(out.astype(jnp.float32) - ref)))
    assert err < 3e-2, f"mismatch vs reference: max abs err = {err}"

    print("KERNEL_OK")
</pallas_src>

<mosaic_0001>
module attributes {stable_mosaic.version = 11 : i64} {
  func.func @dgd_hidden_kernel(%arg0: i32, %arg1: memref<16x20xf32, #tpu.memory_space<vmem>>, %arg2: memref<20x100xbf16, #tpu.memory_space<vmem>>, %arg3: memref<1x100xf32, #tpu.memory_space<vmem>>, %arg4: memref<100x100xbf16, #tpu.memory_space<vmem>>, %arg5: memref<1x100xf32, #tpu.memory_space<vmem>>, %arg6: memref<100x100xbf16, #tpu.memory_space<vmem>>, %arg7: memref<1x100xf32, #tpu.memory_space<vmem>>, %arg8: memref<16x100xbf16, #tpu.memory_space<vmem>>) attributes {dimension_semantics = [#tpu.dimension_semantics<parallel>], iteration_bounds = array<i64: 4>, scalar_prefetch = 0 : i64, scratch_operands = 0 : i64, tpu.core_type = #tpu.core_type<tc>, window_params = [{transform_indices = @transform_0, window_bounds = array<i64: 16, 20>}, {pipeline_mode = #tpu.pipeline_mode<synchronous>, transform_indices = @transform_1, window_bounds = array<i64: 20, 100>}, {pipeline_mode = #tpu.pipeline_mode<synchronous>, transform_indices = @transform_2, window_bounds = array<i64: 1, 100>}, {pipeline_mode = #tpu.pipeline_mode<synchronous>, transform_indices = @transform_3, window_bounds = array<i64: 100, 100>}, {pipeline_mode = #tpu.pipeline_mode<synchronous>, transform_indices = @transform_4, window_bounds = array<i64: 1, 100>}, {pipeline_mode = #tpu.pipeline_mode<synchronous>, transform_indices = @transform_5, window_bounds = array<i64: 100, 100>}, {pipeline_mode = #tpu.pipeline_mode<synchronous>, transform_indices = @transform_6, window_bounds = array<i64: 1, 100>}, {transform_indices = @transform_7, window_bounds = array<i64: 16, 100>}]} {
    %c0 = arith.constant 0 : index
    %c0_0 = arith.constant 0 : index
    %0 = vector.load %arg1[%c0, %c0_0] : memref<16x20xf32, #tpu.memory_space<vmem>>, vector<16x20xf32>
    %1 = arith.truncf %0 : vector<16x20xf32> to vector<16x20xbf16>
    %c0_1 = arith.constant 0 : index
    %c0_2 = arith.constant 0 : index
    %2 = vector.load %arg2[%c0_1, %c0_2] : memref<20x100xbf16, #tpu.memory_space<vmem>>, vector<20x100xbf16>
    %cst = arith.constant dense<0.000000e+00> : vector<16x100xf32>
    %3 = tpu.matmul %1, %2, %cst {dimension_numbers = #tpu.dot_dimension_numbers<[1], [0], [0], [1], [0, 0, 1, 1], [], []>} : vector<16x20xbf16>, vector<20x100xbf16>, vector<16x100xf32> -> vector<16x100xf32>
    %c0_3 = arith.constant 0 : index
    %c0_4 = arith.constant 0 : index
    %4 = vector.load %arg3[%c0_3, %c0_4] : memref<1x100xf32, #tpu.memory_space<vmem>>, vector<1x100xf32>
    %5 = vector.broadcast %4 : vector<1x100xf32> to vector<16x100xf32>
    %6 = arith.addf %3, %5 : vector<16x100xf32>
    %cst_5 = arith.constant 0.000000e+00 : f32
    %7 = vector.broadcast %cst_5 : f32 to vector<16x100xf32>
    %8 = arith.maximumf %6, %7 : vector<16x100xf32>
    %9 = arith.truncf %8 : vector<16x100xf32> to vector<16x100xbf16>
    %c0_6 = arith.constant 0 : index
    %c0_7 = arith.constant 0 : index
    %10 = vector.load %arg4[%c0_6, %c0_7] : memref<100x100xbf16, #tpu.memory_space<vmem>>, vector<100x100xbf16>
    %cst_8 = arith.constant dense<0.000000e+00> : vector<16x100xf32>
    %11 = tpu.matmul %9, %10, %cst_8 {dimension_numbers = #tpu.dot_dimension_numbers<[1], [0], [0], [1], [0, 0, 1, 1], [], []>} : vector<16x100xbf16>, vector<100x100xbf16>, vector<16x100xf32> -> vector<16x100xf32>
    %c0_9 = arith.constant 0 : index
    %c0_10 = arith.constant 0 : index
    %12 = vector.load %arg5[%c0_9, %c0_10] : memref<1x100xf32, #tpu.memory_space<vmem>>, vector<1x100xf32>
    %13 = vector.broadcast %12 : vector<1x100xf32> to vector<16x100xf32>
    %14 = arith.addf %11, %13 : vector<16x100xf32>
    %cst_11 = arith.constant 0.000000e+00 : f32
    %15 = vector.broadcast %cst_11 : f32 to vector<16x100xf32>
    %16 = arith.maximumf %14, %15 : vector<16x100xf32>
    %17 = arith.truncf %16 : vector<16x100xf32> to vector<16x100xbf16>
    %c0_12 = arith.constant 0 : index
    %c0_13 = arith.constant 0 : index
    %18 = vector.load %arg6[%c0_12, %c0_13] : memref<100x100xbf16, #tpu.memory_space<vmem>>, vector<100x100xbf16>
    %cst_14 = arith.constant dense<0.000000e+00> : vector<16x100xf32>
    %19 = tpu.matmul %17, %18, %cst_14 {dimension_numbers = #tpu.dot_dimension_numbers<[1], [0], [0], [1], [0, 0, 1, 1], [], []>} : vector<16x100xbf16>, vector<100x100xbf16>, vector<16x100xf32> -> vector<16x100xf32>
    %c0_15 = arith.constant 0 : index
    %c0_16 = arith.constant 0 : index
    %20 = vector.load %arg7[%c0_15, %c0_16] : memref<1x100xf32, #tpu.memory_space<vmem>>, vector<1x100xf32>
    %21 = vector.broadcast %20 : vector<1x100xf32> to vector<16x100xf32>
    %22 = arith.addf %19, %21 : vector<16x100xf32>
    %cst_17 = arith.constant 0.000000e+00 : f32
    %23 = vector.broadcast %cst_17 : f32 to vector<16x100xf32>
    %24 = arith.maximumf %22, %23 : vector<16x100xf32>
    %25 = arith.truncf %24 : vector<16x100xf32> to vector<16x100xbf16>
    %c0_18 = arith.constant 0 : index
    %c0_19 = arith.constant 0 : index
    %26 = vector.load %arg8[%c0_18, %c0_19] : memref<16x100xbf16, #tpu.memory_space<vmem>>, vector<16x100xbf16>
    tpu.vector_store %arg8[%c0_18, %c0_19], %25 {strides = array<i32>} : memref<16x100xbf16, #tpu.memory_space<vmem>>, vector<16x100xbf16>,
    return
  }
  func.func @transform_0(%arg0: i32) -> (i32, i32) {
    %c0_i32 = arith.constant 0 : i32
    %c0_i32_0 = arith.constant 0 : i32
    return %arg0, %c0_i32 : i32, i32
  }
  func.func @transform_1(%arg0: i32) -> (i32, i32) {
    %c0_i32 = arith.constant 0 : i32
    %c0_i32_0 = arith.constant 0 : i32
    %c0_i32_1 = arith.constant 0 : i32
    return %c0_i32, %c0_i32_0 : i32, i32
  }
  func.func @transform_2(%arg0: i32) -> (i32, i32) {
    %c0_i32 = arith.constant 0 : i32
    %c0_i32_0 = arith.constant 0 : i32
    %c0_i32_1 = arith.constant 0 : i32
    return %c0_i32, %c0_i32_0 : i32, i32
  }
  func.func @transform_3(%arg0: i32) -> (i32, i32) {
    %c0_i32 = arith.constant 0 : i32
    %c0_i32_0 = arith.constant 0 : i32
    %c0_i32_1 = arith.constant 0 : i32
    return %c0_i32, %c0_i32_0 : i32, i32
  }
  func.func @transform_4(%arg0: i32) -> (i32, i32) {
    %c0_i32 = arith.constant 0 : i32
    %c0_i32_0 = arith.constant 0 : i32
    %c0_i32_1 = arith.constant 0 : i32
    return %c0_i32, %c0_i32_0 : i32, i32
  }
  func.func @transform_5(%arg0: i32) -> (i32, i32) {
    %c0_i32 = arith.constant 0 : i32
    %c0_i32_0 = arith.constant 0 : i32
    %c0_i32_1 = arith.constant 0 : i32
    return %c0_i32, %c0_i32_0 : i32, i32
  }
  func.func @transform_6(%arg0: i32) -> (i32, i32) {
    %c0_i32 = arith.constant 0 : i32
    %c0_i32_0 = arith.constant 0 : i32
    %c0_i32_1 = arith.constant 0 : i32
    return %c0_i32, %c0_i32_0 : i32, i32
  }
  func.func @transform_7(%arg0: i32) -> (i32, i32) {
    %c0_i32 = arith.constant 0 : i32
    %c0_i32_0 = arith.constant 0 : i32
    return %arg0, %c0_i32 : i32, i32
  }
}

</mosaic_0001>

<bundles_post_ra>
// kernel: tpu_custom_call.1
= control target key start
LH: loop header
LB: loop body
LE: loop exit
PB: predicated region body
PF: predicated region fallthrough
CT: control target
= control target key end

     0   :  { %12 = vsyncpa [#allocation3], 0  ;;  %s1013_s0 = inlined_call_operand.vmem [shape: f32[64,20], index: 0, kind: input, shape index: {}]   ;;  %s1014_s1 = inlined_call_operand.vmem [shape: bf16[20,100], index: 1, kind: input, shape index: {}]   ;;  %s1015_s2 = inlined_call_operand.vmem [shape: f32[1,100], index: 2, kind: input, shape index: {}]   ;;  %s1016_s3 = inlined_call_operand.vmem [shape: bf16[100,100], index: 3, kind: input, shape index: {}]   ;;  %s1017_s4 = inlined_call_operand.vmem [shape: f32[1,100], index: 4, kind: input, shape index: {}]   ;;  %s1018_s5 = inlined_call_operand.hbm [shape: bf16[100,100], index: 5, kind: input, shape index: {}]   ;;  %s1019_s6 = inlined_call_operand.vmem [shape: f32[1,100], index: 6, kind: input, shape index: {}]   ;;  %s1020_s7 = inlined_call_operand.hbm [shape: bf16[64,100], index: 7, kind: output, shape index: {}]  }
   0x1   :  { %13 = vsyncpa [#allocation4], 0 }
   0x2   :  { %15 = vsyncpa [#allocation4 + $0x1], 0  ;;  %s878_s24 = smov 0   ;;  %s880_s25 = smov 0  }
   0x3   :  { %s882_s26 = smov 0   ;;  %s884_s27 = smov 0  }
   0x4 LB: > { %s899_s28 = sadd.s32 4294967295, %s831_s27   ;;  %s595_s29 = sadd.s32 4294967294, %s831_s27   ;;  %s831_s27 = sphi %s884_s27, %s1026_s27   ;;  %s827_s26 = sphi %s882_s26, %s1025_s26   ;;  %s823_s25 = sphi %s880_s25, %s1024_s25   ;;  %s819_s24 = sphi %s878_s24, %s1023_s24  }
   0x5   : > { %s903_s30 = sadd.s32 1, %s831_s27   ;;  %s180_s8 = sadd.s32 1, %s827_s26 }
   0x6   : > { %s177_s9 = ssub.s32 %s831_s27, %s903_s30  ;;  %p190_p0 = scmp.ne.s32.totalorder %s827_s26, %s823_s25 }
   0x7   : > { %p178_p1 = scmp.eq.s32.totalorder %s177_s9, 0  ;;  %p191_p2 = scmp.eq.s32.totalorder %s899_s28, 3 }
   0x8   : > { %p196_p3 = scmp.ne.s32.totalorder %s823_s25, %s819_s24  ;;  %p197_p4 = scmp.eq.s32.totalorder %s595_s29, 3 }
   0x9   : > { %s914_s10 = scalar_select %p178_p1, %s827_s26, %s180_s8  }
   0xa   : > { %p916_p5 = por %p191_p2, %p190_p0  ;;  %p920_p6 = por %p197_p4, %p196_p3 }
   0xb   : > { %p596_p7 = scmp.ge.s32.totalorder %s831_s27, 1  ;;  %p204_p8 = scmp.lt.s32.totalorder %s831_s27, 5 }
   0xc   : > { %p692_p9 = scmp.eq.s32.totalorder %s899_s28, 0  ;;  %s227_s15 = sshll.u32 %s1018_s5, 4  ;;  %s228_s15 = int_to_ptr.hbm [resolvable:$true] %s227_s15 }
   0xd   : > { %p205_p10 = pnand %p596_p7, %p204_p8  ;;  %s833_s16 = smov [#allocation2]  }
   0xe   : > { %s229_s17 = sshll.u32 %s833_s16, 4  ;;  %s834_s18 = smov 64   ;;  %s230_s17 = int_to_ptr.vmem [resolvable:$true] %s229_s17 }
   0xf   : > { %p684_p11 = pneg %p205_p10  ;;  %s835_s19 = smov 4  }
  0x10   : > { %257 = sbr.rel (%p205_p10) target bundleno = 465 (0x1d1), region = 48 }
  0x11   : > { %p685_p12 = pnand %p692_p9, %p684_p11 }
  0x13   : > { %687 = dma.hbm_to_vmem [thread:$0]  (!%p685_p12), %s228_s15, 832, %s230_s17, [#allocation3], %s834_s18, %s834_s18, %s835_s19  }
  0x15   : > { %810 = dma.done.wait (%p692_p9), [#allocation3], 832  }
  0x16   : > { %812 = vsyncadd (%p692_p9), [#allocation3], 4294966464  ;;  %s602_s20 = sshll.u32 %s899_s28, 1  ;;  %v303_v0 = vld [vmem:[%s1014_s1 + $0x8] sm:$0x3]  ;;  %vm321_vm0 = vcmask 1041408  }
  0x17   : > { %p291_p13 = scmp.lt.s32.totalorder %s602_s20, 7  ;;  %v313_v1 = vunpack.c.l.b16 %v303_v0  ;;  %v354_v2 = vld [vmem:[%s1016_s3 + $0x30] sm:$0x3]  ;;  %v664_v7 = vld [vmem:[%s1014_s1] sm:$0xff]  ;;  %v670_v11 = vld [vmem:[%s1016_s3 + $0x28] sm:$0xff]  ;;  %vm317_vm1 = vcmask 162816  }
  0x18   : > { %v384_v3 = vunpack.c.l.b16 %v354_v2  ;;  %v669_v13 = vld [vmem:[%s1016_s3 + $0x20] sm:$0xff]  ;;  %v668_v14 = vld [vmem:[%s1016_s3 + $0x18] sm:$0xff]  ;;  %v667_v15 = vld [vmem:[%s1016_s3 + $0x10] sm:$0xff]  ;;  %vm398_vm2 = vcmask 818176   ;;  %s287_s21 = sand.u32 1, %s823_s25   ;;  %vm502_vm3 = vcmask 814080  }
  0x19   : > { %s1028_s20 = smov (!%p291_p13, %s602_s20), 7  ;;  %v315_v4 = vpack.c.b16 %v313_v1, %v313_v1  ;;  %v666_v16 = vld [vmem:[%s1016_s3 + $0x8] sm:$0xff]  ;;  %v665_v17 = vld [vmem:[%s1016_s3] sm:$0xff]  ;;  %v434_v18 = vld [vmem:[#allocation2 + $0x30] sm:$0x3]  ;;  %s601_s22 = sshll.u32 %s287_s21, 3 }
  0x1a   : > { %s603_s23 = sshll.u32 %s1028_s20, 3  ;;  %v391_v5 = vpack.c.b16 %v384_v3, %v384_v3  ;;  %v464_v19 = vunpack.c.l.b16 %v434_v18  ;;  %v676_v22 = vld [vmem:[#allocation2 + $0x28] sm:$0xff]  ;;  %v675_v23 = vld [vmem:[#allocation2 + $0x20] sm:$0xff]  ;;  %v674_v32 = vld [vmem:[#allocation2 + $0x18] sm:$0xff]  ;;  %s289_s13 = scalar_lea.vmem [#allocation5], %s601_s22 }
  0x1b   : > { %s294_s14 = scalar_lea.vmem %s1013_s0, %s603_s23  ;;  %v323_v6 = vsel %vm321_vm0, %v315_v4, 0  ;;  %v732_v25 = vld [vmem:[%s1015_s2] ss:$0 sm:$0xff]  ;;  %v673_v33 = vld [vmem:[#allocation2 + $0x10] sm:$0xff]  ;;  %v672_v34 = vld [vmem:[#allocation2 + $0x8] sm:$0xff]  ;;  %s677_s23 = sshll.u32 %s899_s28, 3 }
  0x1c   : > { %331 = vmatpush.bf16.msra.mxu0 %v323_v6  ;;  %v298_v8 = vld [vmem:[%s294_s14] sm:$0xff]  ;;  %v299_v9 = vld [vmem:[%s294_s14 + $0x8] sm:$0xff]  ;;  %v403_v10 = vsel %vm321_vm0, %v391_v5, 0  ;;  %v471_v20 = vpack.c.b16 %v464_v19, %v464_v19  ;;  %s517_s9 = scalar_lea.hbm %s1020_s7, %s677_s23  ;;  %s518_s14 = sshll.u32 %s289_s13, 4  ;;  %s519_s14 = int_to_ptr.vmem [resolvable:$true] %s518_s14 }
  0x1d   : > { %406 = vmatpush.bf16.msra.mxu1 %v403_v10  ;;  %v300_v12 = vpack.c.bf16 %v299_v9, %v298_v8  ;;  %v671_v35 = vld [vmem:[#allocation2] sm:$0xff]  ;;  %s520_s15 = sshll.u32 %s517_s9, 4  ;;  %s506_s16 = scalar_lea.sflag [#allocation4], %s287_s21  ;;  %s521_s15 = int_to_ptr.hbm [resolvable:$true] %s520_s15 }
  0x1e   : > { %v482_v21 = vsel %vm321_vm0, %v471_v20, 0  ;;  %v733_v37 = vld [vmem:[%s1017_s4] ss:$0 sm:$0xff]  ;;  %s779_s28 = sshra.s32 %s521_s15, 4  ;;  %s785_s20 = scalar_lea.hbm %s1020_s7, 32  ;;  %s780_s28 = int_to_ptr.hbm [resolvable:$true] %s779_s28 }
  0x1f   : > { %485 = vmatpush.bf16.msra.mxu2 %v482_v21  ;;  %v734_v44 = vld [vmem:[%s1019_s6] ss:$0 sm:$0xff]  ;;  %s781_s17 = scalar_lea.hbm %s780_s28, 8  ;;  %p786_p3 = scmp.lt.s32.totalorder %s780_s28, %s1020_s7 }
  0x20   : > { %332 = vmatpush.bf16.msra.mxu0 %v664_v7  ;;  %p782_p0 = scmp.ne.s32.totalorder %s780_s28, %s781_s17  ;;  %p787_p4 = scmp.lt.s32.totalorder %s785_s20, %s781_s17 }
  0x21   : > { %407 = vmatpush.bf16.msra.mxu1 %v670_v11 }
  0x22   : > { %p783_p1 = pnand %p782_p0, %p916_p5  ;;  %p788_p7 = por %p787_p4, %p786_p3 }
  0x23   : > { %608 = vmatmul.msk.bf16.vlgmr.msra.gmra.mxu0 %vm317_vm1, %v300_v12  ;;  %486 = vmatpush.bf16.msra.mxu2 %v676_v22 }
  0x24   : > { %p784_p2 = pneg %p783_p1 }
  0x25   : > { %408 = vmatpush.bf16.msra.mxu1 %v669_v13 }
  0x26   : > { %p789_p8 = pnand %p788_p7, %p784_p2 }
  0x27   : > { %487 = vmatpush.bf16.msra.mxu2 %v675_v23 }
  0x29   : > { %409 = vmatpush.bf16.msra.mxu1 %v668_v14 }
  0x2b   : > { %488 = vmatpush.bf16.msra.mxu2 %v674_v32 }
  0x2d   : > { %410 = vmatpush.bf16.msra.mxu1 %v667_v15 }
  0x2f   : > { %489 = vmatpush.bf16.msra.mxu2 %v673_v33 }
  0x31   : > { %411 = vmatpush.bf16.msra.mxu1 %v666_v16 }
  0x33   : > { %490 = vmatpush.bf16.msra.mxu2 %v672_v34 }
  0x35   : > { %412 = vmatpush.bf16.msra.mxu1 %v665_v17 }
  0x37   : > { %491 = vmatpush.bf16.msra.mxu2 %v671_v35 }
  0xa0   : > { %v334_v24 = vpop.f32.mrf.mxu0 }
  0xa1   : > { %v335_v26 = vadd.f32 %v732_v25, %v334_v24 }
  0xa3   : > { %v339_v29 = vmax.f32 %v335_v26, 0.0 }
  0xa8   : > { %v336_v27 = vpop.f32.mrf.mxu0 }
  0xa9   : > { %v337_v28 = vadd.f32 %v732_v25, %v336_v27 }
  0xab   : > { %v340_v30 = vmax.f32 %v337_v28, 0.0 }
  0xad   : > { %v341_v31 = vpack.c.bf16 %v340_v30, %v339_v29 }
  0xaf   : > { %633 = vmatmul.msk.bf16.vlgmr.msra.gmra.mxu1 %vm398_vm2, %v341_v31 }
 0x12c   : > { %v414_v36 = vpop.f32.mrf.mxu1 }
 0x12d   : > { %v415_v38 = vadd.f32 %v733_v37, %v414_v36 }
 0x12f   : > { %v419_v41 = vmax.f32 %v415_v38, 0.0 }
 0x134   : > { %v416_v39 = vpop.f32.mrf.mxu1 }
 0x135   : > { %v417_v40 = vadd.f32 %v733_v37, %v416_v39 }
 0x137   : > { %v420_v42 = vmax.f32 %v417_v40, 0.0 }
 0x139   : > { %v421_v43 = vpack.c.bf16 %v420_v42, %v419_v41 }
 0x13b   : > { %658 = vmatmul.msk.bf16.vlgmr.msra.gmra.mxu2 %vm398_vm2, %v421_v43 }
 0x1be   : > { %v493_v45 = vpop.f32.mrf.mxu2 }
 0x1bf   : > { %v494_v46 = vadd.f32 %v734_v44, %v493_v45 }
 0x1c1   : > { %v498_v47 = vmax.f32 %v494_v46, 0.0 }
 0x1c3   : > { %v500_v48 = vpack.c.bf16 %v498_v47, %v498_v47 }
 0x1c5   : > { %503 = vst.msk [vmem:[%s289_s13] sm:$0xf] %vm502_vm3, %v500_v48 }
 0x1c6   : > { %v495_v49 = vpop.f32.mrf.mxu2 }
 0x1c7   : > { %v496_v50 = vadd.f32 %v734_v44, %v495_v49 }
 0x1c9   : > { %v499_v51 = vmax.f32 %v496_v50, 0.0 }
 0x1cb   : > { %v501_v52 = vpack.c.bf16 %v499_v51, %v499_v51 }
 0x1cd   : > { %504 = vst.msk [vmem:[%s289_s13 + $0x4] sm:$0xf] %vm502_vm3, %v501_v52 }
 0x1ce   : > { %792 = shalt.err (!%p789_p8)
}
 0x1cf   : > { %s836_s21 = smov 64   ;;  %s837_s29 = smov 4  }
 0x1d0   : > { %682 = dma.vmem_to_hbm [thread:$0]  (%p916_p5), %s519_s14, 128, %s521_s15, %s506_s16, %s836_s21, %s836_s21, %s837_s29  }
 0x1d1 PF: > { %p694_p9 = scmp.ge.s32.totalorder %s831_s27, 2  ;;  %s535_s8 = sand.u32 1, %s819_s24  }
 0x1d2   : > { %s536_s9 = scalar_lea.sflag [#allocation4], %s535_s8 }
 0x1d3   : > { %p689_p10 = pnand %p694_p9, %p920_p6 }
 0x1d5   : > { %p690_p11 = pneg %p689_p10 }
 0x1d7   : > { %814 = dma.done.wait (%p690_p11), %s536_s9, 128  }
 0x1d8   : > { %816 = vsyncadd (%p690_p11), %s536_s9, 4294967168  ;;  %p18_p12 = scmp.ge.s32.totalorder %s903_s30, 6   ;;  %s1023_s24 = smov %s823_s25 }
 0x1d9   : > { %s1024_s25 = smov %s827_s26  ;;  %s1025_s26 = smov %s914_s10 }
 0x1da   : > { %s1026_s27 = smov %s903_s30  ;;  %20 = sbr.rel (!%p18_p12) target bundleno = 4 (0x4), region = 88 }
 0x1df   :  { %542 = vsyncpa [#allocation3], 1 }
 0x1e0   :  { %544 = vsyncpa [#allocation3 + $0x1], 1 }
 0x1e1   :  { %545 = vsyncpa [#allocation4], 1 }
 0x1e2   :  { %547 = vsyncpa [#allocation4 + $0x1], 1 }

</bundles_post_ra>
